<compile_context>
chip_gen: v7x
topology: tpu7x:2x2x1
jax: 0.10.0
libtpu: 0.0.40
codegen_flags: <defaults>
</compile_context>

<pallas_src>
import jax
import jax.numpy as jnp
import numpy as np
from jax.experimental import pallas as pl
from jax.experimental.pallas import tpu as pltpu

# ---- small, deterministic hyper-parameters consistent with TFnet.__init__ ----
FIELD_NUM = 4
NUMERICAL = 2
FEATURE_SIZES = [10, 10, 7, 9]
EMB_DIM = 8            # embedding_dim (D)
M = 4                  # m
DEEP_NODE = 32         # deep_node (K)
BATCH = 8
INTERACTION = FIELD_NUM * (FIELD_NUM - 1) // 2     # Q = 6
LEFT, RIGHT = [], []
for _i in range(FIELD_NUM):
    for _j in range(_i + 1, FIELD_NUM):
        LEFT.append(_i)
        RIGHT.append(_j)
BN_EPS = 1e-5

# Packed vocab layout for the fused embedding lookup.  Categorical vocab rows come
# FIRST (so the in-kernel concat [one-hot ; xv] is sublane-aligned: 16 + 2 rows),
# numerical fields get one trailing "value" row each.
CAT_SIZES = FEATURE_SIZES[NUMERICAL:]                             # [7, 9]
CAT_TOTAL = int(sum(CAT_SIZES))                                   # 16 (multiple of 8)
CAT_OFFSET = [int(x) for x in np.cumsum([0] + CAT_SIZES[:-1])]    # [0, 7]
VOCAB_TOTAL = CAT_TOTAL + NUMERICAL                               # 18


# ----------------------------- Pallas kernel ---------------------------------
def tfnet_kernel(xiv_ref, gat_ref, pcomb_ref, rmt2_ref, wfi_ref,
                 bias_ref, wfc_ref, bfc_ref, o_ref):
    f32 = jnp.float32
    tb = xiv_ref.shape[1]                 # batch tile (on lanes)
    xiv = xiv_ref[...]                    # (4, tb): rows 0..1 = xv, rows 2..3 = xi (f32)

    # ---- cheap one-hot build: one 16-row iota, one compare per categorical field,
    #      then a sublane-aligned concat with the numerical value rows -------------
    rows = jax.lax.broadcasted_iota(jnp.int32, (CAT_TOTAL, tb), 0).astype(f32)
    hit = None
    for j in range(FIELD_NUM - NUMERICAL):
        tgt = xiv[NUMERICAL + j:NUMERICAL + j + 1, :] + float(CAT_OFFSET[j])
        m = rows == tgt                    # exact: small ints in f32
        hit = m if hit is None else jnp.logical_or(hit, m)
    oh = jnp.concatenate([hit.astype(f32), xiv[0:NUMERICAL, :]], axis=0)   # (18, tb)

    # ---- single stacked gather matmul: rows 0:48 vi, 48:96 vj, 96:128 em_pre -----
    g = jnp.dot(gat_ref[...], oh, preferred_element_type=f32)              # (128, tb)
    QD = INTERACTION * EMB_DIM
    prods = g[0:QD, :] * g[QD:2 * QD, :]                                   # (48, tb)
    em_pre = g[2 * QD:2 * QD + DEEP_NODE, :]                               # (32, tb)

    # ---- one stacked matmul over prods: per-pair sums (x M) | T3-diag reduction --
    pc = jnp.dot(pcomb_ref[...], prods, preferred_element_type=f32)        # (28, tb)
    p_rep = pc[0:INTERACTION * M, :]                                       # (24, tb)
    ga_l = pc[INTERACTION * M:, :]                                         # (4, tb)

    # softmax over m (rows)
    ga_l = ga_l - jnp.max(ga_l, axis=0, keepdims=True)
    ga_e = jnp.exp(ga_l)
    ga = ga_e * pl.reciprocal(jnp.sum(ga_e, axis=0, keepdims=True), approx=True)

    # s[b,q,m] = (vi.vj)[b,q] * ga[b,m] * rowsum(T2)[m]; gc & BN folded into W_fi
    bm_t = jnp.dot(rmt2_ref[...], ga, preferred_element_type=f32)          # (24, tb)
    sh = p_rep * bm_t

    # ---- fused deep branches: one matmul for th, em_pre already computed,
    #      shared bias + relu, one (1, 64) final fc --------------------------------
    th_pre = jnp.dot(wfi_ref[...], sh, preferred_element_type=f32)         # (32, tb)
    dc = jnp.maximum(jnp.concatenate([th_pre, em_pre], axis=0) + bias_ref[...], 0.0)

    logit = jnp.dot(wfc_ref[...], dc, preferred_element_type=f32) + bfc_ref[...]
    o_ref[...] = pl.reciprocal(1.0 + jnp.exp(-logit), approx=True)         # (1, tb)


# ------------------------------ parameters -----------------------------------
def init_params(key):
    keys = jax.random.split(key, 12)
    p = {}
    p["emb2"] = [jax.random.normal(jax.random.fold_in(keys[0], i), (fs, EMB_DIM), jnp.float32)
                 for i, fs in enumerate(FEATURE_SIZES)]
    # TODO(synk): fm_1st_embedding is defined in __init__ but never used in forward; omitted.
    p["T3"] = jax.random.normal(keys[1], (EMB_DIM, M, EMB_DIM), jnp.float32)
    p["T2"] = jax.random.normal(keys[2], (M, EMB_DIM * EMB_DIM), jnp.float32)
    p["gc"] = jax.random.normal(keys[3], (INTERACTION,), jnp.float32)
    p["W_fi"] = jax.random.normal(keys[4], (INTERACTION * M, DEEP_NODE), jnp.float32) * 0.1
    p["b_fi"] = jax.random.normal(keys[5], (DEEP_NODE,), jnp.float32) * 0.1
    p["W_emb"] = jax.random.normal(keys[6], (FIELD_NUM * EMB_DIM, DEEP_NODE), jnp.float32) * 0.1
    p["b_emb"] = jax.random.normal(keys[7], (DEEP_NODE,), jnp.float32) * 0.1
    p["W_fc"] = jax.random.normal(keys[8], (2 * DEEP_NODE, 1), jnp.float32) * 0.1
    p["b_fc"] = jax.random.normal(keys[9], (1,), jnp.float32) * 0.1
    for name in ("fi", "emb"):   # BatchNorm1d defaults (eval mode)
        p[f"bn_{name}_gamma"] = jnp.ones((DEEP_NODE,), jnp.float32)
        p[f"bn_{name}_beta"] = jnp.zeros((DEEP_NODE,), jnp.float32)
        p[f"bn_{name}_mean"] = jnp.zeros((DEEP_NODE,), jnp.float32)
        p[f"bn_{name}_var"] = jnp.ones((DEEP_NODE,), jnp.float32)
    return p


def _bn_affine(params, name):
    scale = params[f"bn_{name}_gamma"] / jnp.sqrt(params[f"bn_{name}_var"] + BN_EPS)
    shift = params[f"bn_{name}_beta"] - params[f"bn_{name}_mean"] * scale
    return scale, shift


def _cdiv(a, b):
    return -(-a // b)


def _round_up(a, b):
    return _cdiv(a, b) * b


# ------------------------------ wrapper ---------------------------------------
def tfnet_forward(params, xi, xv, tile_b_max=4096):
    D, Fn, Q, Mm, K = EMB_DIM, FIELD_NUM, INTERACTION, M, DEEP_NODE
    B = xi.shape[0]

    # ---- batch tiling: large lane-dense tiles; >=2 grid steps when B allows so
    #      dimension_semantics=("parallel",) engages both TensorCores on v7x ------
    if B < 256:
        tile_b = max(8, _round_up(B, 8))
        num_tiles = 1
    else:
        num_tiles = max(2, _cdiv(B, tile_b_max))
        tile_b = _round_up(_cdiv(B, num_tiles), 128)
        num_tiles = _cdiv(B, tile_b)
    b_pad = tile_b * num_tiles
    pad = b_pad - B

    # ---- single streamed O(B) input: rows 0..1 = xv, rows 2..3 = xi (exact in f32)
    xiv = jnp.concatenate([xv.astype(jnp.float32).T,
                           xi.astype(jnp.float32).T], axis=0)          # (4, B)
    xiv = jnp.pad(xiv, ((0, 0), (0, pad)))                             # (4, b_pad)

    # ---- constant structure matrices (numpy literals, folded at trace time) -----
    slt = np.zeros((Q * D, Fn * D), np.float32)      # left-field gather
    srt = np.zeros((Q * D, Fn * D), np.float32)      # right-field gather
    for q, (l, r) in enumerate(zip(LEFT, RIGHT)):
        for d in range(D):
            slt[q * D + d, l * D + d] = 1.0
            srt[q * D + d, r * D + d] = 1.0
    prqt = np.zeros((Q * Mm, Q * D), np.float32)     # per-pair reduce, repeated over m
    for q in range(Q):
        prqt[q * Mm:(q + 1) * Mm, q * D:(q + 1) * D] = 1.0

    # ---- block-diagonal packed embedding table in the new vocab layout ----------
    wblk = jnp.zeros((VOCAB_TOTAL, Fn * D), jnp.float32)
    for f in range(Fn):
        tbl = params["emb2"][f]
        if f < NUMERICAL:
            wblk = wblk.at[CAT_TOTAL + f, f * D:(f + 1) * D].set(tbl[0])
        else:
            o = CAT_OFFSET[f - NUMERICAL]
            wblk = wblk.at[o:o + FEATURE_SIZES[f], f * D:(f + 1) * D].set(tbl)
    wblk_t = wblk.T                                                    # (F*D, 18)

    # ---- one-time parameter folding (BN eval affine, gc, biases, wblk fusion) ---
    fi_scale, fi_shift = _bn_affine(params, "fi")
    em_scale, em_shift = _bn_affine(params, "emb")

    # stacked gather: rows 0:QD -> vi, QD:2QD -> vj, 2QD:2QD+K -> em_pre  (128, 18)
    wemb_t = (params["W_emb"] * em_scale[None, :]).T                   # (K, F*D)
    gat = jnp.concatenate([jnp.asarray(slt) @ wblk_t,
                           jnp.asarray(srt) @ wblk_t,
                           wemb_t @ wblk_t], axis=0)                   # (2*Q*D + K, 18)

    # stacked prods consumer: rows 0:Q*M per-pair sums, rows Q*M:Q*M+M T3-diag (28, 48)
    d_idx = jnp.arange(D)
    t3diag = params["T3"][d_idx, :, d_idx]                             # (D, M): T3[d,m,d]
    t3rep_t = jnp.tile(t3diag.T, (1, Q))                               # (M, Q*D)
    pcomb = jnp.concatenate([jnp.asarray(prqt), t3rep_t], axis=0)      # (Q*M + M, Q*D)

    t2_rowsum = jnp.sum(params["T2"], axis=1)                          # (M,)
    rmt2_t = jnp.tile(jnp.diag(t2_rowsum), (Q, 1))                     # (Q*M, M)

    gc_rows = jnp.repeat(params["gc"], Mm)                             # (Q*M,)
    wfi_t = (params["W_fi"] * gc_rows[:, None] * fi_scale[None, :]).T  # (K, Q*M)
    bias_col = jnp.concatenate([params["b_fi"] * fi_scale + fi_shift,
                                params["b_emb"] * em_scale + em_shift])[:, None]  # (2K, 1)
    wfc_row = params["W_fc"][:, 0][None, :]                            # (1, 2K)
    bfc = params["b_fc"].reshape(1, 1)

    # ---- pallas_call: 1-D batch grid; constants use grid-invariant full blocks ---
    def const_spec(shape):
        return pl.BlockSpec(shape, lambda b, n=len(shape): (0,) * n)

    out = pl.pallas_call(
        tfnet_kernel,
        out_shape=jax.ShapeDtypeStruct((1, b_pad), jnp.float32),
        grid=(num_tiles,),
        in_specs=[pl.BlockSpec((4, tile_b), lambda b: (0, b)),         # xiv (streamed)
                  const_spec((2 * Q * D + K, VOCAB_TOTAL)),            # gat      (128, 18)
                  const_spec((Q * Mm + Mm, Q * D)),                    # pcomb    (28, 48)
                  const_spec((Q * Mm, Mm)),                            # rmt2     (24, 4)
                  const_spec((K, Q * Mm)),                             # wfi      (32, 24)
                  const_spec((2 * K, 1)),                              # bias     (64, 1)
                  const_spec((1, 2 * K)),                              # wfc      (1, 64)
                  const_spec((1, 1))],                                 # bfc
        out_specs=pl.BlockSpec((1, tile_b), lambda b: (0, b)),
        compiler_params=pltpu.CompilerParams(
            dimension_semantics=("parallel",),
            vmem_limit_bytes=32 * 1024 * 1024),
    )(xiv, gat, pcomb, rmt2_t, wfi_t, bias_col, wfc_row, bfc)

    # torch.sum(outputs, 1) over the size-1 feature dim -> (B,)
    return out[0, :B]


# ----------------------- pure-JAX reference (for checking) --------------------
def embed_fields(params, xi, xv):
    e_list = []
    for i in range(FIELD_NUM):
        tbl = params["emb2"][i]
        if i < NUMERICAL:
            e_list.append(tbl[0][None, :] * xv[:, i][:, None])
        else:
            e_list.append(tbl[xi[:, i - NUMERICAL]])
    return e_list


def tfnet_ref(params, xi, xv):
    e_list = embed_fields(params, xi, xv)
    vi = jnp.stack([e_list[l] for l in LEFT], axis=1)   # (B, Q, D)
    vj = jnp.stack([e_list[r] for r in RIGHT], axis=1)
    d_idx = jnp.arange(EMB_DIM)
    t3diag = params["T3"][d_idx, :, d_idx]
    ga = jnp.einsum('bqd,dm,bqd->bm', vi, t3diag, vj)   # torch 'bqd,dmd,bqd->bm'
    ga = jax.nn.softmax(ga, axis=1)
    T1 = jnp.einsum('bm,mn->bmn', ga, params["T2"])
    s = jnp.einsum('bqd,bmn,bqd->bqm', vi, T1, vj)
    sh = (s * params["gc"][None, :, None]).reshape(s.shape[0], -1)

    def bn(x, name):
        g, b = params[f"bn_{name}_gamma"], params[f"bn_{name}_beta"]
        m_, v = params[f"bn_{name}_mean"], params[f"bn_{name}_var"]
        return (x - m_) / jnp.sqrt(v + BN_EPS) * g + b

    th = jax.nn.relu(bn(sh @ params["W_fi"] + params["b_fi"], "fi"))
    emb = jnp.concatenate(e_list, axis=1)
    em = jax.nn.relu(bn(emb @ params["W_emb"] + params["b_emb"], "emb"))
    out = jnp.concatenate([th, em], axis=1) @ params["W_fc"] + params["b_fc"]
    return jax.nn.sigmoid(out).sum(axis=1)


if __name__ == "__main__":
    key = jax.random.PRNGKey(0)
    pkey, k_small, k_mid, k_big = jax.random.split(key, 4)
    params = init_params(pkey)

    def make_inputs(k, batch):
        ki, kv = jax.random.split(k)
        xi = jnp.stack(
            [jax.random.randint(jax.random.fold_in(ki, j), (batch,), 0,
                                FEATURE_SIZES[NUMERICAL + j])
             for j in range(FIELD_NUM - NUMERICAL)], axis=1).astype(jnp.int32)
        xv = jax.random.uniform(kv, (batch, NUMERICAL), dtype=jnp.float32)
        return xi, xv

    fwd = jax.jit(tfnet_forward)

    # small single-tile batch, a 2-tile batch, and a larger padded 2-tile batch
    for batch, kb in ((BATCH, k_small), (1000, k_mid), (2500, k_big)):
        xi, xv = make_inputs(kb, batch)
        out = jax.block_until_ready(fwd(params, xi, xv))
        ref = jax.block_until_ready(tfnet_ref(params, xi, xv))
        assert out.shape == (batch,)
        np.testing.assert_allclose(np.asarray(out), np.asarray(ref),
                                   rtol=5e-3, atol=5e-3)

    print("KERNEL_OK")
</pallas_src>

<mosaic_0001>
module attributes {stable_mosaic.version = 11 : i64} {
  func.func @tfnet_kernel(%arg0: i32, %arg1: memref<4x8xf32, #tpu.memory_space<vmem>>, %arg2: memref<128x18xf32, #tpu.memory_space<vmem>>, %arg3: memref<28x48xf32, #tpu.memory_space<vmem>>, %arg4: memref<24x4xf32, #tpu.memory_space<vmem>>, %arg5: memref<32x24xf32, #tpu.memory_space<vmem>>, %arg6: memref<64x1xf32, #tpu.memory_space<vmem>>, %arg7: memref<1x64xf32, #tpu.memory_space<vmem>>, %arg8: memref<1x1xf32, #tpu.memory_space<vmem>>, %arg9: memref<1x8xf32, #tpu.memory_space<vmem>>) attributes {dimension_semantics = [#tpu.dimension_semantics<parallel>], iteration_bounds = array<i64: 1>, scalar_prefetch = 0 : i64, scratch_operands = 0 : i64, tpu.core_type = #tpu.core_type<tc>, window_params = [{transform_indices = @transform_0, window_bounds = array<i64: 4, 8>}, {pipeline_mode = #tpu.pipeline_mode<synchronous>, transform_indices = @transform_1, window_bounds = array<i64: 128, 18>}, {pipeline_mode = #tpu.pipeline_mode<synchronous>, transform_indices = @transform_2, window_bounds = array<i64: 28, 48>}, {pipeline_mode = #tpu.pipeline_mode<synchronous>, transform_indices = @transform_3, window_bounds = array<i64: 24, 4>}, {pipeline_mode = #tpu.pipeline_mode<synchronous>, transform_indices = @transform_4, window_bounds = array<i64: 32, 24>}, {pipeline_mode = #tpu.pipeline_mode<synchronous>, transform_indices = @transform_5, window_bounds = array<i64: 64, 1>}, {pipeline_mode = #tpu.pipeline_mode<synchronous>, transform_indices = @transform_6, window_bounds = array<i64: 1, 64>}, {pipeline_mode = #tpu.pipeline_mode<synchronous>, transform_indices = @transform_7, window_bounds = array<i64: 1, 1>}, {transform_indices = @transform_8, window_bounds = array<i64: 1, 8>}]} {
    %c0 = arith.constant 0 : index
    %c0_0 = arith.constant 0 : index
    %0 = vector.load %arg1[%c0, %c0_0] : memref<4x8xf32, #tpu.memory_space<vmem>>, vector<4x8xf32>
    %1 = tpu.iota {dimensions = array<i32: 0>} : vector<16x8xi32>
    %2 = arith.sitofp %1 : vector<16x8xi32> to vector<16x8xf32>
    %3 = vector.extract_strided_slice %0 {offsets = [2, 0], sizes = [1, 8], strides = [1, 1]} : vector<4x8xf32> to vector<1x8xf32>
    %cst = arith.constant 0.000000e+00 : f32
    %4 = vector.broadcast %cst : f32 to vector<1x8xf32>
    %5 = arith.addf %3, %4 : vector<1x8xf32>
    %6 = vector.broadcast %5 : vector<1x8xf32> to vector<16x8xf32>
    %7 = arith.cmpf oeq, %2, %6 : vector<16x8xf32>
    %8 = vector.extract_strided_slice %0 {offsets = [3, 0], sizes = [1, 8], strides = [1, 1]} : vector<4x8xf32> to vector<1x8xf32>
    %cst_1 = arith.constant 7.000000e+00 : f32
    %9 = vector.broadcast %cst_1 : f32 to vector<1x8xf32>
    %10 = arith.addf %8, %9 : vector<1x8xf32>
    %11 = vector.broadcast %10 : vector<1x8xf32> to vector<16x8xf32>
    %12 = arith.cmpf oeq, %2, %11 : vector<16x8xf32>
    %13 = arith.ori %7, %12 : vector<16x8xi1>
    %14 = arith.extui %13 : vector<16x8xi1> to vector<16x8xi32>
    %15 = arith.sitofp %14 : vector<16x8xi32> to vector<16x8xf32>
    %16 = vector.extract_strided_slice %0 {offsets = [0, 0], sizes = [2, 8], strides = [1, 1]} : vector<4x8xf32> to vector<2x8xf32>
    %17 = tpu.concatenate %15, %16 in 0 : vector<16x8xf32>, vector<2x8xf32> -> vector<18x8xf32>
    %c0_2 = arith.constant 0 : index
    %c0_3 = arith.constant 0 : index
    %18 = vector.load %arg2[%c0_2, %c0_3] : memref<128x18xf32, #tpu.memory_space<vmem>>, vector<128x18xf32>
    %cst_4 = arith.constant dense<0.000000e+00> : vector<128x8xf32>
    %19 = tpu.matmul %18, %17, %cst_4 {dimension_numbers = #tpu.dot_dimension_numbers<[1], [0], [0], [1], [0, 0, 1, 1], [], []>} : vector<128x18xf32>, vector<18x8xf32>, vector<128x8xf32> -> vector<128x8xf32>
    %20 = vector.extract_strided_slice %19 {offsets = [0, 0], sizes = [48, 8], strides = [1, 1]} : vector<128x8xf32> to vector<48x8xf32>
    %21 = vector.extract_strided_slice %19 {offsets = [48, 0], sizes = [48, 8], strides = [1, 1]} : vector<128x8xf32> to vector<48x8xf32>
    %22 = arith.mulf %20, %21 : vector<48x8xf32>
    %23 = vector.extract_strided_slice %19 {offsets = [96, 0], sizes = [32, 8], strides = [1, 1]} : vector<128x8xf32> to vector<32x8xf32>
    %c0_5 = arith.constant 0 : index
    %c0_6 = arith.constant 0 : index
    %24 = vector.load %arg3[%c0_5, %c0_6] : memref<28x48xf32, #tpu.memory_space<vmem>>, vector<28x48xf32>
    %cst_7 = arith.constant dense<0.000000e+00> : vector<28x8xf32>
    %25 = tpu.matmul %24, %22, %cst_7 {dimension_numbers = #tpu.dot_dimension_numbers<[1], [0], [0], [1], [0, 0, 1, 1], [], []>} : vector<28x48xf32>, vector<48x8xf32>, vector<28x8xf32> -> vector<28x8xf32>
    %26 = vector.extract_strided_slice %25 {offsets = [0, 0], sizes = [24, 8], strides = [1, 1]} : vector<28x8xf32> to vector<24x8xf32>
    %27 = vector.extract_strided_slice %25 {offsets = [24, 0], sizes = [4, 8], strides = [1, 1]} : vector<28x8xf32> to vector<4x8xf32>
    %cst_8 = arith.constant dense<0xFF800000> : vector<8xf32>
    %28 = vector.multi_reduction <maximumf>, %27, %cst_8 [0] : vector<4x8xf32> to vector<8xf32>
    %29 = vector.shape_cast %28 : vector<8xf32> to vector<1x8xf32>
    %30 = vector.broadcast %29 : vector<1x8xf32> to vector<4x8xf32>
    %31 = arith.subf %27, %30 : vector<4x8xf32>
    %32 = math.exp %31 : vector<4x8xf32>
    %cst_9 = arith.constant dense<0.000000e+00> : vector<8xf32>
    %33 = vector.multi_reduction <add>, %32, %cst_9 [0] : vector<4x8xf32> to vector<8xf32>
    %34 = vector.shape_cast %33 : vector<8xf32> to vector<1x8xf32>
    %35 = tpu.reciprocal %34 {approx = true} : vector<1x8xf32> -> vector<1x8xf32>
    %36 = vector.broadcast %35 : vector<1x8xf32> to vector<4x8xf32>
    %37 = arith.mulf %32, %36 : vector<4x8xf32>
    %c0_10 = arith.constant 0 : index
    %c0_11 = arith.constant 0 : index
    %38 = vector.load %arg4[%c0_10, %c0_11] : memref<24x4xf32, #tpu.memory_space<vmem>>, vector<24x4xf32>
    %cst_12 = arith.constant dense<0.000000e+00> : vector<24x8xf32>
    %39 = tpu.matmul %38, %37, %cst_12 {dimension_numbers = #tpu.dot_dimension_numbers<[1], [0], [0], [1], [0, 0, 1, 1], [], []>} : vector<24x4xf32>, vector<4x8xf32>, vector<24x8xf32> -> vector<24x8xf32>
    %40 = arith.mulf %26, %39 : vector<24x8xf32>
    %c0_13 = arith.constant 0 : index
    %c0_14 = arith.constant 0 : index
    %41 = vector.load %arg5[%c0_13, %c0_14] : memref<32x24xf32, #tpu.memory_space<vmem>>, vector<32x24xf32>
    %cst_15 = arith.constant dense<0.000000e+00> : vector<32x8xf32>
    %42 = tpu.matmul %41, %40, %cst_15 {dimension_numbers = #tpu.dot_dimension_numbers<[1], [0], [0], [1], [0, 0, 1, 1], [], []>} : vector<32x24xf32>, vector<24x8xf32>, vector<32x8xf32> -> vector<32x8xf32>
    %43 = tpu.concatenate %42, %23 in 0 : vector<32x8xf32>, vector<32x8xf32> -> vector<64x8xf32>
    %c0_16 = arith.constant 0 : index
    %c0_17 = arith.constant 0 : index
    %44 = vector.load %arg6[%c0_16, %c0_17] : memref<64x1xf32, #tpu.memory_space<vmem>>, vector<64x1xf32>
    %45 = vector.broadcast %44 : vector<64x1xf32> to vector<64x8xf32>
    %46 = arith.addf %43, %45 : vector<64x8xf32>
    %cst_18 = arith.constant 0.000000e+00 : f32
    %47 = vector.broadcast %cst_18 : f32 to vector<64x8xf32>
    %48 = arith.maximumf %46, %47 : vector<64x8xf32>
    %c0_19 = arith.constant 0 : index
    %c0_20 = arith.constant 0 : index
    %49 = vector.load %arg7[%c0_19, %c0_20] : memref<1x64xf32, #tpu.memory_space<vmem>>, vector<1x64xf32>
    %cst_21 = arith.constant dense<0.000000e+00> : vector<1x8xf32>
    %50 = tpu.matmul %49, %48, %cst_21 {dimension_numbers = #tpu.dot_dimension_numbers<[1], [0], [0], [1], [0, 0, 1, 1], [], []>} : vector<1x64xf32>, vector<64x8xf32>, vector<1x8xf32> -> vector<1x8xf32>
    %c0_22 = arith.constant 0 : index
    %c0_23 = arith.constant 0 : index
    %51 = vector.load %arg8[%c0_22, %c0_23] : memref<1x1xf32, #tpu.memory_space<vmem>>, vector<1x1xf32>
    %52 = vector.broadcast %51 : vector<1x1xf32> to vector<1x8xf32>
    %53 = arith.addf %50, %52 : vector<1x8xf32>
    %cst_24 = arith.constant 0.000000e+00 : f32
    %54 = vector.broadcast %cst_24 : f32 to vector<1x8xf32>
    %55 = arith.subf %54, %53 : vector<1x8xf32>
    %56 = math.exp %55 : vector<1x8xf32>
    %cst_25 = arith.constant 1.000000e+00 : f32
    %57 = vector.broadcast %cst_25 : f32 to vector<1x8xf32>
    %58 = arith.addf %57, %56 : vector<1x8xf32>
    %59 = tpu.reciprocal %58 {approx = true} : vector<1x8xf32> -> vector<1x8xf32>
    %c0_26 = arith.constant 0 : index
    %c0_27 = arith.constant 0 : index
    %60 = vector.load %arg9[%c0_26, %c0_27] : memref<1x8xf32, #tpu.memory_space<vmem>>, vector<1x8xf32>
    tpu.vector_store %arg9[%c0_26, %c0_27], %59 {strides = array<i32>} : memref<1x8xf32, #tpu.memory_space<vmem>>, vector<1x8xf32>,
    return
  }
  func.func @transform_0(%arg0: i32) -> (i32, i32) {
    %c0_i32 = arith.constant 0 : i32
    %c0_i32_0 = arith.constant 0 : i32
    return %c0_i32, %arg0 : i32, i32
  }
  func.func @transform_1(%arg0: i32) -> (i32, i32) {
    %c0_i32 = arith.constant 0 : i32
    %c0_i32_0 = arith.constant 0 : i32
    %c0_i32_1 = arith.constant 0 : i32
    return %c0_i32, %c0_i32_0 : i32, i32
  }
  func.func @transform_2(%arg0: i32) -> (i32, i32) {
    %c0_i32 = arith.constant 0 : i32
    %c0_i32_0 = arith.constant 0 : i32
    %c0_i32_1 = arith.constant 0 : i32
    return %c0_i32, %c0_i32_0 : i32, i32
  }
  func.func @transform_3(%arg0: i32) -> (i32, i32) {
    %c0_i32 = arith.constant 0 : i32
    %c0_i32_0 = arith.constant 0 : i32
    %c0_i32_1 = arith.constant 0 : i32
    return %c0_i32, %c0_i32_0 : i32, i32
  }
  func.func @transform_4(%arg0: i32) -> (i32, i32) {
    %c0_i32 = arith.constant 0 : i32
    %c0_i32_0 = arith.constant 0 : i32
    %c0_i32_1 = arith.constant 0 : i32
    return %c0_i32, %c0_i32_0 : i32, i32
  }
  func.func @transform_5(%arg0: i32) -> (i32, i32) {
    %c0_i32 = arith.constant 0 : i32
    %c0_i32_0 = arith.constant 0 : i32
    %c0_i32_1 = arith.constant 0 : i32
    return %c0_i32, %c0_i32_0 : i32, i32
  }
  func.func @transform_6(%arg0: i32) -> (i32, i32) {
    %c0_i32 = arith.constant 0 : i32
    %c0_i32_0 = arith.constant 0 : i32
    %c0_i32_1 = arith.constant 0 : i32
    return %c0_i32, %c0_i32_0 : i32, i32
  }
  func.func @transform_7(%arg0: i32) -> (i32, i32) {
    %c0_i32 = arith.constant 0 : i32
    %c0_i32_0 = arith.constant 0 : i32
    %c0_i32_1 = arith.constant 0 : i32
    return %c0_i32, %c0_i32_0 : i32, i32
  }
  func.func @transform_8(%arg0: i32) -> (i32, i32) {
    %c0_i32 = arith.constant 0 : i32
    %c0_i32_0 = arith.constant 0 : i32
    return %c0_i32, %arg0 : i32, i32
  }
}

</mosaic_0001>

<bundles_post_ra>
// kernel: tile.14
= control target key start
LH: loop header
LB: loop body
LE: loop exit
PB: predicated region body
PF: predicated region fallthrough
CT: control target
= control target key end

     0   :  { %s51_s8 = smov 40   ;;  %s52_s11 = smov 24   ;;  %vm3_vm0 = vcmask 64512   ;;  %vm9_vm1 = vcmask 392512   ;;  %vm15_vm2 = vcmask 326912   ;;  %vm21_vm3 = vcmask 261312   ;;  %s87_s0 = inlined_call_operand.vmem [shape: f32[4,6,8], index: 0, kind: input, shape index: {}]   ;;  %s88_s1 = inlined_call_operand.vmem [shape: f32[4,48], index: 1, kind: output, shape index: {}]  }
   0x1   :  { %v41_v0 = vld [vmem:[%s87_s0 + $0x5] ss:$8 sm:$0xf]   ;;  %v43_v1 = vld [vmem:[%s87_s0 + $0x3] ss:$8 sm:$0xf]  }
   0x2   :  { %7 = vrot.lane.b32.xlu0 %v41_v0, %s51_s8  ;;  %19 = vrot.lane.b32.xlu1 %v43_v1, %s52_s11  ;;  %v42_v2 = vld [vmem:[%s87_s0 + $0x4] ss:$8 sm:$0xf]   ;;  %v44_v3 = vld [vmem:[%s87_s0 + $0x2] ss:$8 sm:$0xf]  }
   0x3   :  { %v2_v4 = vld [vmem:[%s87_s0] ss:$8 sm:$0xf]   ;;  %s53_s18 = smov 32   ;;  %s54_s19 = smov 16   ;;  %vm27_vm4 = vcmask 195712  }
   0x4   :  { %4 = vst.msk [vmem:[#allocation0] sm:$0xf] %vm3_vm0, %v2_v4   ;;  %v45_v5 = vld [vmem:[%s87_s0 + $0x1] ss:$8 sm:$0xf]   ;;  %s55_s0 = smov 8  }
   0x5   :  { %vm33_vm5 = vcmask 130112  }
   0x6   :  { %13 = vrot.lane.b32.xlu0 %v42_v2, %s53_s18  ;;  %25 = vrot.lane.b32.xlu1 %v44_v3, %s54_s19 }
   0xa   :  { %31 = vrot.lane.b32.xlu0 %v45_v5, %s55_s0 }
  0x74   :  { %v8_v6 = vpop.permute.xlu0 %7   ;;  %v20_v7 = vpop.permute.xlu1 %19  }
  0x75   :  { %10 = vst.msk [vmem:[#allocation0] sm:$0xf] %vm9_vm1, %v8_v6  }
  0x78   :  { %v14_v8 = vpop.permute.xlu0 %13   ;;  %v26_v9 = vpop.permute.xlu1 %25  }
  0x79   :  { %16 = vst.msk [vmem:[#allocation0] sm:$0xf] %vm15_vm2, %v14_v8  }
  0x7a   :  { %22 = vst.msk [vmem:[#allocation0] sm:$0xf] %vm21_vm3, %v20_v7  }
  0x7b   :  { %28 = vst.msk [vmem:[#allocation0] sm:$0xf] %vm27_vm4, %v26_v9  }
  0x7c   :  { %v32_v10 = vpop.permute.xlu0 %31  }
  0x7d   :  { %34 = vst.msk [vmem:[#allocation0] sm:$0xf] %vm33_vm5, %v32_v10  }
  0x84   :  { %v38_v11 = vld [vmem:[#allocation0] sm:$0xf] }
  0x85   :  { %40 = vst [vmem:[%s88_s1] sm:$0xf] %v38_v11 }

// kernel: mul.23
= control target key start
LH: loop header
LB: loop body
LE: loop exit
PB: predicated region body
PF: predicated region fallthrough
CT: control target
= control target key end

     0   :  { %s51_s10 = smov 20   ;;  %s52_s11 = smov 12   ;;  %vm3_vm0 = vcmask 31744   ;;  %vm9_vm1 = vcmask 195744   ;;  %vm15_vm2 = vcmask 162944   ;;  %vm21_vm3 = vcmask 130144   ;;  %s87_s0 = inlined_call_operand.vmem [shape: f32[6,4], index: 0, kind: input, shape index: {}]   ;;  %s88_s1 = inlined_call_operand.vmem [shape: f32[24], index: 1, kind: output, shape index: {}]  }
   0x1   :  { %v41_v0 = vld [vmem:[%s87_s0 + $0x5] sm:$0x1]   ;;  %v43_v1 = vld [vmem:[%s87_s0 + $0x3] sm:$0x1]   ;;  %v42_v2 = vld [vmem:[%s87_s0 + $0x4] sm:$0x1]  }
   0x2   :  { %7 = vrot.lane.b32.xlu0 %v41_v0, %s51_s10  ;;  %19 = vrot.lane.b32.xlu1 %v43_v1, %s52_s11  ;;  %v44_v3 = vld [vmem:[%s87_s0 + $0x2] sm:$0x1]   ;;  %v2_v4 = vld [vmem:[%s87_s0] sm:$0x1]   ;;  %s53_s18 = smov 16   ;;  %s54_s19 = smov 8  }
   0x3   :  { %4 = vst.msk [vmem:[#allocation0] sm:$0x1] %vm3_vm0, %v2_v4   ;;  %v45_v5 = vld [vmem:[%s87_s0 + $0x1] sm:$0x1]   ;;  %s55_s0 = smov 4   ;;  %vm27_vm4 = vcmask 97344  }
   0x4   :  { %vm33_vm5 = vcmask 64544  }
   0x6   :  { %13 = vrot.lane.b32.xlu0 %v42_v2, %s53_s18  ;;  %25 = vrot.lane.b32.xlu1 %v44_v3, %s54_s19 }
   0xa   :  { %31 = vrot.lane.b32.xlu0 %v45_v5, %s55_s0 }
  0x74   :  { %v8_v6 = vpop.permute.xlu0 %7   ;;  %v20_v7 = vpop.permute.xlu1 %19  }
  0x75   :  { %10 = vst.msk [vmem:[#allocation0] sm:$0x1] %vm9_vm1, %v8_v6  }
  0x78   :  { %v14_v8 = vpop.permute.xlu0 %13   ;;  %v26_v9 = vpop.permute.xlu1 %25  }
  0x79   :  { %16 = vst.msk [vmem:[#allocation0] sm:$0x1] %vm15_vm2, %v14_v8  }
  0x7a   :  { %22 = vst.msk [vmem:[#allocation0] sm:$0x1] %vm21_vm3, %v20_v7  }
  0x7b   :  { %28 = vst.msk [vmem:[#allocation0] sm:$0x1] %vm27_vm4, %v26_v9  }
  0x7c   :  { %v32_v10 = vpop.permute.xlu0 %31  }
  0x7d   :  { %34 = vst.msk [vmem:[#allocation0] sm:$0x1] %vm33_vm5, %v32_v10  }
  0x84   :  { %v38_v11 = vld [vmem:[#allocation0] sm:$0x1] }
  0x85   :  { %40 = vst [vmem:[%s88_s1] sm:$0x1] %v38_v11 }

// kernel: tfnet_forward.1
= control target key start
LH: loop header
LB: loop body
LE: loop exit
PB: predicated region body
PF: predicated region fallthrough
CT: control target
= control target key end

     0   :  { %s1238_s0 = inlined_call_operand.vmem [shape: f32[4,8], index: 0, kind: input, shape index: {}]   ;;  %s1239_s1 = inlined_call_operand.vmem [shape: f32[128,18], index: 1, kind: input, shape index: {}]   ;;  %s1240_s2 = inlined_call_operand.vmem [shape: f32[28,48], index: 2, kind: input, shape index: {}]   ;;  %s1241_s3 = inlined_call_operand.vmem [shape: f32[24,4], index: 3, kind: input, shape index: {}]   ;;  %s1242_s4 = inlined_call_operand.vmem [shape: f32[32,24], index: 4, kind: input, shape index: {}]   ;;  %s1243_s5 = inlined_call_operand.vmem [shape: f32[64,1], index: 5, kind: input, shape index: {}]   ;;  %s1244_s6 = inlined_call_operand.vmem [shape: f32[1,64], index: 6, kind: input, shape index: {}]   ;;  %s1245_s7 = inlined_call_operand.<no memory space> [shape: f32[1,1], index: 7, kind: input, shape index: {}]   ;;  %s1246_s8 = inlined_call_operand.hbm [shape: f32[1,8], index: 8, kind: output, shape index: {}]  }
   0x1   :  { %v13_v0 = vstv %s1245_s7 }
   0x2   :  { %14 = vst [vmem:[#allocation2] sm:$0x1] %v13_v0 }
   0x3   :  { %v32_v1 = vld [vmem:[%s1238_s0] sm:$0xf]  ;;  %v33_v2 = vlaneseq  ;;  %vm74_vm0 = vcmask 146432  }
   0x4   :  { %v58_v3 = vld [vmem:[%s1239_s1] sm:$0xff]  ;;  %v45_v5 = vadd.f32 7.0, %v32_v1 }
   0x5   :  { %v1077_v4 = vshrl.u32 %v33_v2, 7  ;;  %861 = vmatprep.mubr.msk.f32.mxu0 %vm74_vm0, %v58_v3 }
   0x7   :  { %v35_v6 = vadd.s32 8, %v1077_v4  ;;  %v36_v7 = vcvt.s32.f32 %v1077_v4  ;;  %v41_v8 = vsub.s32 2, %v1077_v4  ;;  %v48_v9 = vsub.s32 3, %v1077_v4 }
   0x8   :  { %15 = vsyncpa [#allocation4], 0  ;;  %vm123_vm8 = vcmask 1041408   ;;  %v1017_v13 = vmov 1.0|1.0   ;;  %v59_v14 = vld [vmem:[%s1239_s1 + $0x8] sm:$0xff] }
   0x9   :  { %v37_v10 = vcvt.s32.f32 %v35_v6  ;;  %v42_v11 = vrot.slane %v32_v1, %v41_v8  ;;  %v49_v12 = vrot.slane %v45_v5, %v48_v9  ;;  %v60_v15 = vld [vmem:[%s1239_s1 + $0x10] sm:$0xff]  ;;  %v61_v16 = vld [vmem:[%s1239_s1 + $0x18] sm:$0xff]  ;;  %v62_v17 = vld [vmem:[%s1239_s1 + $0x20] sm:$0xff]  ;;  %vm282_vm9 = vcmask 392192   ;;  %s1022_s25 = smov [#allocation3]  }
   0xa   :  { %v63_v18 = vld [vmem:[%s1239_s1 + $0x28] sm:$0xff]  ;;  %v64_v19 = vld [vmem:[%s1239_s1 + $0x30] sm:$0xff]  ;;  %v65_v20 = vld [vmem:[%s1239_s1 + $0x38] sm:$0xff]  ;;  %v1018_v50 = vmov 0.0   ;;  %vm1019_vm10 = vmmov 0   ;;  %vm380_vm11 = vcmask 60416  }
   0xb   :  { %vm43_vm1 = vcmp.eq.f32.partialorder %v36_v7, %v42_v11  ;;  %vm44_vm2 = vcmp.eq.f32.partialorder %v37_v10, %v42_v11  ;;  %vm50_vm3 = vcmp.eq.f32.partialorder %v36_v7, %v49_v12  ;;  %vm51_vm4 = vcmp.eq.f32.partialorder %v37_v10, %v49_v12  ;;  %v66_v21 = vld [vmem:[%s1239_s1 + $0x40] sm:$0xff]  ;;  %v67_v22 = vld [vmem:[%s1239_s1 + $0x48] sm:$0xff]  ;;  %v68_v23 = vld [vmem:[%s1239_s1 + $0x50] sm:$0xff] }
   0xc   :  { %vm52_vm5 = vmor %vm43_vm1, %vm50_vm3  ;;  %v69_v24 = vld [vmem:[%s1239_s1 + $0x58] sm:$0xff]  ;;  %v278_v25 = vld [vmem:[%s1240_s2] sm:$0xff]  ;;  %vm413_vm12 = vcmask 1043456   ;;  %vm403_vm13 = vcmask 31744   ;;  %vm504_vm14 = vcmask 195584   ;;  %vm677_vm15 = vcmask 523264  }
   0xd   :  { %vm53_vm6 = vmor %vm44_vm2, %vm51_vm4  ;;  %897 = vmatprep.mubr.msk.f32.mxu1 %vm282_vm9, %v278_v25  ;;  %v279_v47 = vld [vmem:[%s1240_s2 + $0x8] sm:$0xff]  ;;  %v280_v48 = vld [vmem:[%s1240_s2 + $0x10] sm:$0xff] }
   0xe   :  { %vm945_vm7 = vmpackc.low %vm53_vm6, %vm52_vm5  ;;  %v281_v49 = vld [vmem:[%s1240_s2 + $0x18] sm:$0xf]  ;;  %v400_v11 = vld [vmem:[%s1241_s3] sm:$0xff] }
   0xf   :  { %946 = vmatprep.subr.msk.bf16.mxu0 %vm945_vm7, %v1017_v13  ;;  %v401_v12 = vld [vmem:[%s1241_s3 + $0x8] sm:$0xff] }
  0x10   :  { %948 = vmatpush3.bf16.msk.msra.mxu0 %vm945_vm7, %v1017_v13  ;;  %v402_v13 = vld [vmem:[%s1241_s3 + $0x10] sm:$0xff]  ;;  %v607_v25 = vld [vmem:[%s1243_s5 + $0x28] sm:$0xff]  ;;  %s764_s3 = sshll.u32 %s1022_s25, 4  ;;  %s765_s3 = int_to_ptr.vmem [resolvable:$true] %s764_s3 }
  0x11   :  { %859 = vmatprep.subr.msk.mxu0 %vm123_vm8, %v32_v1  ;;  %s997_s26 = scalar_lea.vmem %s765_s3, 32  ;;  %p998_p1 = scmp.lt.s32.totalorder %s765_s3, %s765_s3 }
  0x14   :  { %860 = vmatpush3.msk.msra.mxu0 %vm123_vm8, %v32_v1 }
  0x15   :  { %862 = vmatmul.mubr.msk.f32.vlgmr.msra.gmra.mrb[0].mxu0 %vm74_vm0, %v59_v14  ;;  %v70_v14 = vld [vmem:[%s1239_s1 + $0x60] sm:$0xff] }
  0x16   :  { %864 = vmatprep.mubr.msk.f32.mxu0 %vm74_vm0, %v60_v15  ;;  %v71_v15 = vld [vmem:[%s1239_s1 + $0x68] sm:$0xff] }
  0x19   :  { %865 = vmatmul.mubr.msk.f32.gmra.mrb[2].mxu0 %vm74_vm0, %v61_v16  ;;  %v72_v16 = vld [vmem:[%s1239_s1 + $0x70] sm:$0xff] }
  0x1a   :  { %867 = vmatprep.mubr.msk.f32.mxu0 %vm74_vm0, %v62_v17  ;;  %v73_v17 = vld [vmem:[%s1239_s1 + $0x78] sm:$0xff] }
  0x1d   :  { %868 = vmatmul.mubr.msk.f32.gmra.mrb[4].mxu0 %vm74_vm0, %v63_v18  ;;  %v500_v18 = vld [vmem:[%s1242_s4] sm:$0xff] }
  0x1e   :  { %870 = vmatprep.mubr.msk.f32.mxu0 %vm74_vm0, %v64_v19  ;;  %v602_v19 = vld [vmem:[%s1243_s5] sm:$0xff] }
  0x21   :  { %871 = vmatmul.mubr.msk.f32.gmra.mrb[6].mxu0 %vm74_vm0, %v65_v20  ;;  %v604_v20 = vld [vmem:[%s1243_s5 + $0x10] sm:$0xff] }
  0x22   :  { %873 = vmatprep.mubr.msk.f32.mxu0 %vm74_vm0, %v66_v21  ;;  %v1020_v21 = vmov 0  }
  0x23   :  { %983 = vset.pattern.permute.xlu0 %v1020_v21  ;;  %984 = vset.pattern.permute.xlu1 %v1020_v21 }
  0x24   :  { %612 = vperm.xlu0 %983, %v602_v19   ;;  %622 = vperm.xlu1 %984, %v604_v20  }
  0x25   :  { %874 = vmatmul.mubr.msk.f32.gmra.mrb[8].mxu0 %vm74_vm0, %v67_v22  ;;  %v603_v22 = vld [vmem:[%s1243_s5 + $0x8] sm:$0xff] }
  0x26   :  { %876 = vmatprep.mubr.msk.f32.mxu0 %vm74_vm0, %v68_v23  ;;  %v605_v23 = vld [vmem:[%s1243_s5 + $0x18] sm:$0xff] }
  0x28   :  { %617 = vperm.xlu0 %983, %v603_v22   ;;  %627 = vperm.xlu1 %984, %v605_v23  }
  0x29   :  { %877 = vmatmul.mubr.msk.f32.gmra.mrb[10].mxu0 %vm74_vm0, %v69_v24  ;;  %v606_v24 = vld [vmem:[%s1243_s5 + $0x20] sm:$0xff] }
  0x2a   :  { %879 = vmatprep.mubr.msk.f32.mxu0 %vm74_vm0, %v70_v14 }
  0x2c   :  { %632 = vperm.xlu0 %983, %v606_v24   ;;  %637 = vperm.xlu1 %984, %v607_v25  }
  0x2d   :  { %880 = vmatmul.mubr.msk.f32.gmra.mrb[12].mxu0 %vm74_vm0, %v71_v15 }
  0x2e   :  { %882 = vmatprep.mubr.msk.f32.mxu0 %vm74_vm0, %v72_v16  ;;  %v666_v16 = vld [vmem:[%s1244_s6] sm:$0x1]  ;;  %s993_s6 = scalar_lea.vmem %s765_s3, 16 }
  0x2f   :  { %p994_p0 = scmp.ne.s32.totalorder %s765_s3, %s993_s6  ;;  %p999_p2 = scmp.lt.s32.totalorder %s997_s26, %s993_s6 }
  0x31   :  { %883 = vmatmul.mubr.msk.f32.gmra.mrb[14].mxu0 %vm74_vm0, %v73_v17  ;;  %v675_v17 = vsub.s32 0, %v1077_v4  ;;  %vm756_vm0 = vcmask 57344   ;;  %p1000_p3 = por %p999_p2, %p998_p1 }
  0x32   :  { %942 = vmatprep.mubr.msk.f32.mxu0 %vm1019_vm10, %v1018_v50 }
  0x33   :  { %p1001_p4 = pnand %p1000_p3, %p994_p0 }
  0xe8   :  { %v863_v26 = vpop.f32.mrb[0].mxu0 }
  0xe9   :  { %v193_v27 = vpop.f32.mrb[1].mxu0 }
  0xec   :  { %v866_v28 = vpop.f32.mrb[2].mxu0 }
  0xed   :  { %v203_v29 = vpop.f32.mrb[3].mxu0 }
  0xf0   :  { %v869_v30 = vpop.f32.mrb[4].mxu0 }
  0xf1   :  { %v213_v31 = vpop.f32.mrb[5].mxu0 }
  0xf4   :  { %v872_v32 = vpop.f32.mrb[6].mxu0 }
  0xf5   :  { %v273_v33 = vmul.f32 %v872_v32, %v863_v26  ;;  %v223_v34 = vpop.f32.mrb[7].mxu0  ;;  %v608_v26 = vld [vmem:[%s1243_s5 + $0x30] sm:$0xff] }
  0xf6   :  { %v272_v35 = vmul.f32 %v223_v34, %v193_v27  ;;  %v609_v27 = vld [vmem:[%s1243_s5 + $0x38] sm:$0xff]  ;;  %642 = vperm.xlu0 %983, %v608_v26  }
  0xf7   :  { %647 = vperm.xlu1 %984, %v609_v27  }
  0xf8   :  { %v875_v36 = vpop.f32.mrb[8].mxu0  ;;  %v949_v37 = vpack.c.bf16 %v273_v33, %v272_v35 }
  0xf9   :  { %v275_v38 = vmul.f32 %v875_v36, %v866_v28  ;;  %v233_v39 = vpop.f32.mrb[9].mxu0  ;;  %v667_v28 = vld [vmem:[#allocation2] sm:$0x1] }
  0xfa   :  { %v274_v40 = vmul.f32 %v233_v39, %v203_v29  ;;  %950 = vmatprep.subr.bf16.mxu1 %v949_v37  ;;  %670 = vperm.xlu0 %983, %v667_v28   ;;  %v501_v39 = vld [vmem:[%s1242_s4 + $0x8] sm:$0xff] }
  0xfb   :  { %952 = vmatpush3.bf16.msra.mxu1 %v949_v37 }
  0xfc   :  { %v953_v41 = vpack.c.bf16 %v275_v38, %v274_v40  ;;  %v878_v42 = vpop.f32.mrb[10].mxu0  ;;  %v502_v40 = vld [vmem:[%s1242_s4 + $0x10] sm:$0xff] }
  0xfd   :  { %v277_v43 = vmul.f32 %v878_v42, %v869_v30  ;;  %v243_v44 = vpop.f32.mrb[11].mxu0  ;;  %v623_v42 = vpop.permute.xlu1 %622 }
  0xfe   :  { %v276_v45 = vmul.f32 %v243_v44, %v213_v31  ;;  %954 = vmatprep.subr.bf16.mxu1 %v953_v41 }
  0xff   :  { %956 = vmatpush3.bf16.msra.mxu1 %v953_v41  ;;  %v503_v41 = vld [vmem:[%s1242_s4 + $0x18] sm:$0xff] }
 0x100   :  { %v957_v46 = vpack.c.bf16 %v277_v43, %v276_v45  ;;  %v613_v43 = vpop.permute.xlu0 %612 }
 0x101   :  { %v628_v44 = vpop.permute.xlu1 %627 }
 0x102   :  { %958 = vmatprep.subr.bf16.mxu1 %v957_v46 }
 0x103   :  { %960 = vmatpush3.bf16.msra.mxu1 %v957_v46 }
 0x104   :  { %903 = vmatprep.subr.mxu1 %v1018_v50  ;;  %v618_v45 = vpop.permute.xlu0 %617 }
 0x105   :  { %v638_v46 = vpop.permute.xlu1 %637 }
 0x106   :  { %898 = vmatmul.mubr.msk.f32.vlgmr.msra.gmra.mrb[0].mxu1 %vm282_vm9, %v279_v47 }
 0x107   :  { %900 = vmatprep.mubr.msk.f32.mxu1 %vm282_vm9, %v280_v48  ;;  %v881_v48 = vpop.f32.mrb[12].mxu0 }
 0x108   :  { %v633_v47 = vpop.permute.xlu0 %632 }
 0x10a   :  { %901 = vmatmul.mubr.msk.f32.gmra.mrb[2].mxu1 %vm282_vm9, %v281_v49  ;;  %v655_v49 = vadd.f32 %v881_v48, %v638_v46 }
 0x10b   :  { %905 = vmatprep.mubr.msk.f32.mxu1 %vm1019_vm10, %v1018_v50 }
 0x1d9   :  { %v1145_v51 = vpop.f32.mrb[0].mxu1 }
 0x1da   :  { %v1147_v52 = vpop.f32.mrb[1].mxu1 }
 0x1dd   :  { %v902_v53 = vpop.f32.mrb[2].mxu1 }
 0x1de   :  { %v381_v54 = vsel %vm380_vm11, %v902_v53, -inf  ;;  %v1149_v55 = vpop.f32.mrb[3].mxu1 }
 0x1df   :  { %v382_v56 = vrot.slane %v381_v54, 4 }
 0x1e1   :  { %v383_v57 = vmax.f32 %v381_v54, %v382_v56  ;;  %v643_v56 = vpop.permute.xlu0 %642 }
 0x1e3   :  { %v384_v58 = vrot.slane %v383_v57, 2 }
 0x1e5   :  { %v385_v59 = vmax.f32 %v383_v57, %v384_v58 }
 0x1e7   :  { %v386_v60 = vrot.slane %v385_v59, 1 }
 0x1e9   :  { %v387_v61 = vmax.f32 %v385_v59, %v386_v60 }
 0x1eb   :  { %v388_v62 = vsub.f32 %v902_v53, %v387_v61  ;;  %v663_v53 = vmax.f32 %v655_v49, 0.0 }
 0x1ed   :  { %v389_v63 = vmul.f32 1.442695, %v388_v62 }
 0x1ef   :  { %985 = vpow2.f32 %v389_v63 }
 0x1f9   :  { %v986_v0 = vpop.eup %985 }
 0x1fa   :  { %v391_v1 = vsel %vm380_vm11, %v986_v0, 0.0 }
 0x1fb   :  { %v392_v2 = vrot.slane %v391_v1, 4 }
 0x1fd   :  { %v393_v3 = vadd.f32 %v392_v2, %v391_v1 }
 0x1ff   :  { %v394_v5 = vrot.slane %v393_v3, 2 }
 0x201   :  { %v395_v6 = vadd.f32 %v394_v5, %v393_v3 }
 0x203   :  { %v396_v7 = vrot.slane %v395_v6, 1 }
 0x205   :  { %v397_v8 = vadd.f32 %v396_v7, %v395_v6 }
 0x207   :  { %987 = vrcp.f32 %v397_v8 }
 0x211   :  { %v988_v9 = vpop.eup %987 }
 0x212   :  { %v399_v10 = vmul.f32 %v988_v9, %v986_v0  ;;  %v1021_v0 = vmov 0.0|0.0  }
 0x213   :  { %965 = vmatprep.subr.bf16.mxu0 %v1021_v0 }
 0x214   :  { %904 = vmatpush3.msk.msra.mxu1 %vm413_vm12, %v399_v10 }
 0x215   :  { %906 = vmatmul.mubr.msk.f32.vlgmr.msra.gmra.mrb[4].mxu1 %vm403_vm13, %v400_v11 }
 0x216   :  { %908 = vmatprep.mubr.msk.f32.mxu1 %vm1019_vm10, %v1018_v50 }
 0x219   :  { %909 = vmatmul.mubr.msk.f32.gmra.mrb[6].mxu1 %vm403_vm13, %v401_v12 }
 0x21a   :  { %911 = vmatprep.mubr.msk.f32.mxu1 %vm1019_vm10, %v1018_v50  ;;  %v253_v50 = vpop.f32.mrb[13].mxu0 }
 0x21d   :  { %912 = vmatmul.mubr.msk.f32.gmra.mrb[8].mxu1 %vm403_vm13, %v402_v13 }
 0x21e   :  { %920 = vmatprep.mubr.msk.f32.mxu1 %vm504_vm14, %v500_v18  ;;  %v671_v18 = vpop.permute.xlu0 %670 }
 0x21f   :  { %v676_v19 = vrot.slane %v671_v18, %v675_v17 }
 0x2e8   :  { %v483_v29 = vpop.f32.mrb[4].mxu1 }
 0x2e9   :  { %v497_v30 = vmul.f32 %v483_v29, %v1147_v52  ;;  %v907_v31 = vpop.f32.mrb[5].mxu1  ;;  %v648_v52 = vpop.permute.xlu1 %647 }
 0x2ec   :  { %v488_v32 = vpop.f32.mrb[6].mxu1 }
 0x2ed   :  { %v498_v33 = vmul.f32 %v1145_v51, %v488_v32  ;;  %v910_v34 = vpop.f32.mrb[7].mxu1  ;;  %v654_v51 = vadd.f32 %v633_v47, %v253_v50 }
 0x2ef   :  { %v961_v35 = vpack.c.bf16 %v498_v33, %v497_v30  ;;  %v662_v54 = vmax.f32 %v654_v51, 0.0 }
 0x2f0   :  { %v493_v36 = vpop.f32.mrb[8].mxu1 }
 0x2f1   :  { %v499_v37 = vmul.f32 %v493_v36, %v1149_v55  ;;  %962 = vmatprep.subr.bf16.mxu1 %v961_v35  ;;  %v913_v38 = vpop.f32.mrb[9].mxu1  ;;  %v884_v55 = vpop.f32.mrb[14].mxu0  ;;  %v972_v59 = vpack.c.bf16 %v663_v53, %v662_v54 }
 0x2f2   :  { %964 = vmatpush3.bf16.msra.mxu1 %v961_v35  ;;  %v657_v57 = vadd.f32 %v884_v55, %v648_v52  ;;  %v263_v58 = vpop.f32.mrb[15].mxu0 }
 0x2f3   :  { %918 = vmatprep.subr.mxu1 %v499_v37  ;;  %v656_v60 = vadd.f32 %v643_v56, %v263_v58 }
 0x2f4   :  { %v665_v61 = vmax.f32 %v657_v57, 0.0 }
 0x2f5   :  { %v664_v62 = vmax.f32 %v656_v60, 0.0 }
 0x2f6   :  { %919 = vmatpush3.msra.mxu1 %v499_v37 }
 0x2f7   :  { %921 = vmatmul.mubr.msk.f32.vlgmr.msra.gmra.mrb[10].mxu1 %vm504_vm14, %v501_v39  ;;  %v975_v63 = vpack.c.bf16 %v665_v61, %v664_v62 }
 0x2f8   :  { %923 = vmatprep.mubr.msk.f32.mxu1 %vm504_vm14, %v502_v40 }
 0x2fb   :  { %924 = vmatmul.mubr.msk.f32.gmra.mrb[12].mxu1 %vm504_vm14, %v503_v41 }
 0x3ca   :  { %v922_v1 = vpop.f32.mrb[10].mxu1 }
 0x3cb   :  { %v651_v2 = vadd.f32 %v922_v1, %v618_v45  ;;  %v583_v3 = vpop.f32.mrb[11].mxu1 }
 0x3cc   :  { %v650_v5 = vadd.f32 %v613_v43, %v583_v3 }
 0x3cd   :  { %v659_v6 = vmax.f32 %v651_v2, 0.0 }
 0x3ce   :  { %v658_v7 = vmax.f32 %v650_v5, 0.0  ;;  %v925_v8 = vpop.f32.mrb[12].mxu1 }
 0x3cf   :  { %v653_v9 = vadd.f32 %v925_v8, %v628_v44  ;;  %v593_v10 = vpop.f32.mrb[13].mxu1 }
 0x3d0   :  { %v966_v11 = vpack.c.bf16 %v659_v6, %v658_v7  ;;  %v652_v12 = vadd.f32 %v623_v42, %v593_v10 }
 0x3d1   :  { %v661_v13 = vmax.f32 %v653_v9, 0.0 }
 0x3d2   :  { %v660_v14 = vmax.f32 %v652_v12, 0.0  ;;  %967 = vmatpush3.bf16.msra.mxu0 %v966_v11 }
 0x3d3   :  { %968 = vmatprep.subr.bf16.mxu0 %v1021_v0 }
 0x3d4   :  { %v969_v15 = vpack.c.bf16 %v661_v13, %v660_v14 }
 0x3d6   :  { %970 = vmatpush3.bf16.msra.mxu0 %v969_v15 }
 0x3d7   :  { %971 = vmatprep.subr.bf16.mxu0 %v1021_v0 }
 0x3da   :  { %973 = vmatpush3.bf16.msra.mxu0 %v972_v59 }
 0x3db   :  { %974 = vmatprep.subr.bf16.mxu0 %v1021_v0 }
 0x3de   :  { %976 = vmatpush3.bf16.msra.mxu0 %v975_v63 }
 0x3e1   :  { %943 = vmatmul.mubr.msk.f32.vlgmr.msra.gmra.mrb[16].mxu0 %vm677_vm15, %v666_v16 }
 0x4b4   :  { %v747_v20 = vpop.f32.mrb[16].mxu0 }
 0x4b5   :  { %v748_v21 = vadd.f32 %v747_v20, %v676_v19  ;;  %v944_v22 = vpop.f32.mrb[17].mxu0 }
 0x4b7   :  { %v751_v23 = vsub.f32 0.0, %v748_v21 }
 0x4b9   :  { %v752_v24 = vmul.f32 1.442695, %v751_v23 }
 0x4bb   :  { %989 = vpow2.f32 %v752_v24 }
 0x4c5   :  { %v990_v25 = vpop.eup %989 }
 0x4c6   :  { %v754_v26 = vadd.f32 1.0, %v990_v25 }
 0x4c8   :  { %991 = vrcp.f32 %v754_v26 }
 0x4d2   :  { %v992_v27 = vpop.eup %991 }
 0x4d3   :  { %757 = vst.msk [vmem:[#allocation3] sm:$0x1] %vm756_vm0, %v992_v27 }
 0x4d4   :  { %1004 = shalt.err (!%p1001_p4)
}
 0x4d5   :  { %s1005_s29 = scalar_lea.hbm %s1246_s8, 16 }
 0x4d6   :  { %p1006_p5 = scmp.ne.s32.totalorder %s1246_s8, %s1005_s29  ;;  %p1009_p6 = scmp.lt.u32.totalorder %s1005_s29, %s1246_s8 }
 0x4d8   :  { %p1011_p7 = pnand %p1009_p6, %p1006_p5 }
 0x4da   :  { %1014 = shalt.err (!%p1011_p7)
}
 0x4db   :  { %767 = dma.vmem_to_hbm [thread:$0]  %s765_s3, 16, %s1246_s8, [#allocation4]  }
 0x4dc   :  { %1015 = dma.done.wait [#allocation4], 16  }
 0x4dd   :  { %1016 = vsyncadd [#allocation4], 4294967280 }
 0x4de   :  { %771 = vsyncpa [#allocation4], 1 }

</bundles_post_ra>
